<compile_context>
chip_gen: v7x
topology: tpu7x:2x2x1
jax: 0.10.0
libtpu: 0.0.40
codegen_flags: <defaults>
</compile_context>

<pallas_src>
import functools

import jax
import jax.numpy as jnp
from jax import lax
from jax.experimental import pallas as pl
from jax.experimental.pallas import tpu as pltpu


def _round_up(x, m):
    return (x + m - 1) // m * m


def _cdiv(a, b):
    return -(-a // b)


def _vmem_limit_bytes():
    """Scoped-VMEM limit: half the chip's physical VMEM, capped at 64 MiB."""
    try:
        cap = int(pltpu.get_tpu_info().vmem_capacity_bytes)
    except Exception:
        cap = None
    if not cap or cap <= 0:
        cap = 64 * 1024 * 1024          # conservative (v7x physical per-TC VMEM)
    return min(cap // 2, 64 * 1024 * 1024)


def _choose_tiling(b, d, itemsize, vmem_budget, tile_k_override=None):
    """Returns (tile_k, nsplits, k_per_split, n_buffers)."""
    tk_full = d if d < 128 else _round_up(d, 128)
    if tile_k_override is not None:
        tk = min(_round_up(max(int(tile_k_override), 128), 128), tk_full)
        n_buf = 3
    else:
        # Resident (B,B) f32 Gram accumulators (x3, double-buffered outputs).
        fixed = 3 * b * b * 4 * 2
        avail = max(vmem_budget - fixed, 2 * 2 * b * 128 * itemsize)
        # Whole feature axis in one block (2 inputs x 2 pipeline buffers)?
        if 2 * 2 * b * tk_full * itemsize <= avail:
            return tk_full, 1, 1, 2
        n_buf = 3                                    # triple-buffer the inputs
        tk = max(128, (avail // (2 * n_buf * b * itemsize)) // 128 * 128)
        tk = min(tk, tk_full)
    if tk >= tk_full:
        return tk_full, 1, 1, 2
    nk_total = _cdiv(d, tk)
    nsplits = 2 if nk_total >= 2 else 1              # 2-way split for v7x megacore
    k_per_split = _cdiv(nk_total, nsplits)
    return tk, nsplits, k_per_split, n_buf


def _input_block_spec(block_shape, index_map, n_buffers):
    if n_buffers > 2:
        try:
            return pl.BlockSpec(block_shape, index_map,
                                pipeline_mode=pl.Buffered(buffer_count=n_buffers))
        except Exception:        # older jax: no pipeline_mode / pl.Buffered
            pass
    return pl.BlockSpec(block_shape, index_map)


def _gram_kernel(s_ref, t_ref, gss_ref, gst_ref, gtt_ref, *,
                 d_total, tile_k, k_per_split, needs_mask, matmul_dtype):
    c = pl.program_id(0)          # "parallel" split of the D reduction
    k = pl.program_id(1)          # "arbitrary" reduction step within the split

    @pl.when(k == 0)
    def _init():
        gss_ref[...] = jnp.zeros_like(gss_ref)
        gst_ref[...] = jnp.zeros_like(gst_ref)
        gtt_ref[...] = jnp.zeros_like(gtt_ref)

    s = s_ref[...]
    t = t_ref[...]

    if needs_mask:
        # NaN/Inf-safe select (not multiply) for partial / overhang tiles.
        off = (c * k_per_split + k) * tile_k
        col = lax.broadcasted_iota(jnp.int32, (1, tile_k), 1) + off
        keep = col < d_total
        s = jnp.where(keep, s, jnp.zeros_like(s))
        t = jnp.where(keep, t, jnp.zeros_like(t))

    s = s.astype(matmul_dtype)
    t = t.astype(matmul_dtype)

    # Contract the feature axis of both operands (no in-kernel transpose).
    dims = (((1,), (1,)), ((), ()))
    gss_ref[...] += lax.dot_general(s, s, dims, preferred_element_type=jnp.float32)
    gst_ref[...] += lax.dot_general(s, t, dims, preferred_element_type=jnp.float32)
    gtt_ref[...] += lax.dot_general(t, t, dims, preferred_element_type=jnp.float32)


def _mmd_epilogue_kernel(gss_ref, gst_ref, gtt_ref, out_ref, *,
                         batch_size, kernel_mul, kernel_num):
    b = batch_size
    gss = jnp.sum(gss_ref[...], axis=0)       # combine per-split partials
    gst = jnp.sum(gst_ref[...], axis=0)
    gtt = jnp.sum(gtt_ref[...], axis=0)

    # Row norms from the Gram diagonals.
    ri = lax.broadcasted_iota(jnp.int32, (b, b), 0)
    ci = lax.broadcasted_iota(jnp.int32, (b, b), 1)
    eye = ri == ci
    dss = jnp.where(eye, gss, 0.0)
    dtt = jnp.where(eye, gtt, 0.0)
    rs_col = jnp.sum(dss, axis=-1, keepdims=True)   # (b, 1)  ||s_i||^2
    rs_row = jnp.sum(dss, axis=-2, keepdims=True)   # (1, b)
    rt_col = jnp.sum(dtt, axis=-1, keepdims=True)   # (b, 1)  ||t_j||^2
    rt_row = jnp.sum(dtt, axis=-2, keepdims=True)   # (1, b)

    # Pairwise squared distances per quadrant; clamp tiny fp negatives.
    l_ss = jnp.maximum(rs_col + rs_row - 2.0 * gss, 0.0)
    l_tt = jnp.maximum(rt_col + rt_row - 2.0 * gtt, 0.0)
    l_st = jnp.maximum(rs_col + rt_row - 2.0 * gst, 0.0)

    # fix_sigma is None in the module => data-dependent bandwidth.
    n = 2 * b
    sum_l2 = jnp.sum(l_ss) + jnp.sum(l_tt) + 2.0 * jnp.sum(l_st)
    bandwidth = sum_l2 / float(n * n - n)
    bandwidth = bandwidth / (kernel_mul ** (kernel_num // 2))
    inv_bw = 1.0 / bandwidth

    if kernel_mul == 2.0:
        # One exp at the widest bandwidth, then repeated squaring on the VPU:
        # exp(-L/(bw*2^i)) = exp(-L/(bw*2^(kn-1)))^(2^(kn-1-i)).
        scale0 = -inv_bw / (kernel_mul ** (kernel_num - 1))

        def ksum(l2m):
            a = jnp.exp(l2m * scale0)
            acc = a
            for _ in range(kernel_num - 1):
                a = a * a
                acc = acc + a
            return jnp.sum(acc)
    else:
        def ksum(l2m):
            acc = jnp.zeros_like(l2m)
            for i in range(kernel_num):
                acc = acc + jnp.exp(l2m * (-inv_bw / (kernel_mul ** i)))
            return jnp.sum(acc)

    # mean(XX + YY - XY - YX); sum(XY) == sum(YX) by symmetry.
    out_ref[0] = (ksum(l_ss) + ksum(l_tt) - 2.0 * ksum(l_st)) / float(b * b)


def mmd_loss(source, target, kernel_mul=2.0, kernel_num=5, *,
             matmul_dtype=jnp.float32, tile_k=None):
    """Pallas-TPU equivalent of MMD_loss(kernel_mul, kernel_num)(source, target)."""
    b = source.shape[0]
    s = source.reshape(b, -1)        # keep native dtype: no host-side upcast
    t = target.reshape(b, -1)
    d = s.shape[1]
    assert t.shape == (b, d), "source/target must flatten to the same (B, D)"
    itemsize = jnp.dtype(s.dtype).itemsize

    vmem_limit = _vmem_limit_bytes()
    tk, nsplits, kps, n_buf = _choose_tiling(b, d, itemsize, vmem_limit // 2, tile_k)
    nk_total = _cdiv(d, tk)
    needs_mask = (nsplits * kps * tk != d)

    if nsplits * kps > nk_total:
        # Odd tile count: wrap the overhang slot back to block 0; its logical
        # offset is >= d, so the in-kernel mask zeroes its contribution.
        def in_idx(c, k):
            return (0, (c * kps + k) % nk_total)
    else:
        def in_idx(c, k):
            return (0, c * kps + k)

    buffers = n_buf if (n_buf > 2 and kps >= 3) else 2
    in_spec = _input_block_spec((b, tk), in_idx, buffers)
    out_spec = pl.BlockSpec((None, b, b), lambda c, k: (c, 0, 0))
    gram_shape = jax.ShapeDtypeStruct((nsplits, b, b), jnp.float32)

    gram_kernel = functools.partial(
        _gram_kernel, d_total=d, tile_k=tk, k_per_split=kps,
        needs_mask=needs_mask, matmul_dtype=matmul_dtype)

    gram_cost = pl.CostEstimate(
        flops=int(6 * b * b * d),                 # three (b,d)x(d,b) Gram blocks
        transcendentals=0,
        bytes_accessed=int(2 * b * d * itemsize + 3 * nsplits * b * b * 4))

    gss_p, gst_p, gtt_p = pl.pallas_call(
        gram_kernel,
        out_shape=[gram_shape, gram_shape, gram_shape],
        grid_spec=pltpu.PrefetchScalarGridSpec(
            num_scalar_prefetch=0,
            grid=(nsplits, kps),
            in_specs=[in_spec, in_spec],
            out_specs=[out_spec, out_spec, out_spec]),
        compiler_params=pltpu.CompilerParams(
            dimension_semantics=("parallel", "arbitrary"),
            vmem_limit_bytes=vmem_limit),
        cost_estimate=gram_cost,
    )(s, t)

    # Tiny O(B^2) epilogue: combine partials -> distances -> bandwidth -> loss.
    epi_kernel = functools.partial(
        _mmd_epilogue_kernel, batch_size=b,
        kernel_mul=float(kernel_mul), kernel_num=int(kernel_num))
    n_exp = 3 * b * b * (1 if float(kernel_mul) == 2.0 else int(kernel_num))
    loss = pl.pallas_call(
        epi_kernel,
        out_shape=jax.ShapeDtypeStruct((1,), jnp.float32),
        grid_spec=pltpu.PrefetchScalarGridSpec(
            num_scalar_prefetch=0,
            grid=(1,),
            in_specs=[pl.BlockSpec((nsplits, b, b), lambda i: (0, 0, 0))] * 3,
            out_specs=pl.BlockSpec(memory_space=pltpu.MemorySpace.SMEM)),
        compiler_params=pltpu.CompilerParams(
            dimension_semantics=("arbitrary",)),
        cost_estimate=pl.CostEstimate(
            flops=int(30 * b * b), transcendentals=int(n_exp),
            bytes_accessed=int(3 * nsplits * b * b * 4 + 4)),
    )(gss_p, gst_p, gtt_p)
    return loss[0]


def _mmd_ref(source, target, kernel_mul=2.0, kernel_num=5):
    # Pure-JAX reference mirroring the PyTorch code exactly.
    b = source.shape[0]
    s = source.reshape(b, -1).astype(jnp.float32)
    t = target.reshape(b, -1).astype(jnp.float32)
    total = jnp.concatenate([s, t], axis=0)
    n = 2 * b
    diff = total[None, :, :] - total[:, None, :]
    l2 = jnp.sum(diff * diff, axis=2)
    bw = jnp.sum(l2) / (n * n - n)
    bw = bw / (kernel_mul ** (kernel_num // 2))
    kmat = sum(jnp.exp(-l2 / (bw * (kernel_mul ** i))) for i in range(kernel_num))
    XX = kmat[:b, :b]
    YY = kmat[b:, b:]
    XY = kmat[:b, b:]
    YX = kmat[b:, :b]
    return jnp.mean(XX + YY - XY - YX)


if __name__ == "__main__":
    key = jax.random.PRNGKey(0)
    k1, k2, k3, k4, k5, k6 = jax.random.split(key, 6)

    # Case 1: module-shaped NCHW activations -> flattened (2, 1024).
    # Whole feature axis fits in one block: no reduction loop, no split.
    src = jax.random.normal(k1, (2, 4, 16, 16), dtype=jnp.float32)
    tgt = jax.random.normal(k2, (2, 4, 16, 16), dtype=jnp.float32)
    out = jax.block_until_ready(mmd_loss(src, tgt))
    ref = jax.block_until_ready(_mmd_ref(src, tgt))
    assert jnp.isfinite(out), "non-finite loss"
    assert jnp.allclose(out, ref, rtol=1e-4, atol=1e-5), (out, ref)

    # Case 2: forced D-tiling -> 2-way "parallel" split (both TCs on v7x),
    # grid reduction with a partial (masked) last tile.
    s2 = jax.random.normal(k3, (4, 1000), dtype=jnp.float32)
    t2 = jax.random.normal(k4, (4, 1000), dtype=jnp.float32)
    out2 = jax.block_until_ready(mmd_loss(s2, t2, tile_k=256))
    ref2 = jax.block_until_ready(_mmd_ref(s2, t2))
    assert jnp.allclose(out2, ref2, rtol=1e-4, atol=1e-5), (out2, ref2)

    # Case 3: odd tile count -> wrapped, fully-masked overhang slot, plus the
    # triple-buffered input pipeline path.
    s3 = jax.random.normal(k5, (4, 1150), dtype=jnp.float32)
    t3 = jax.random.normal(k6, (4, 1150), dtype=jnp.float32)
    out3 = jax.block_until_ready(mmd_loss(s3, t3, tile_k=256))
    ref3 = jax.block_until_ready(_mmd_ref(s3, t3))
    assert jnp.allclose(out3, ref3, rtol=1e-4, atol=1e-5), (out3, ref3)

    print("KERNEL_OK")
</pallas_src>

<mosaic_0001>
module attributes {stable_mosaic.version = 11 : i64} {
  func.func @_gram_kernel(%arg0: i32, %arg1: i32, %arg2: memref<2x1024xf32, #tpu.memory_space<vmem>>, %arg3: memref<2x1024xf32, #tpu.memory_space<vmem>>, %arg4: memref<1x2x2xf32, #tpu.memory_space<vmem>>, %arg5: memref<1x2x2xf32, #tpu.memory_space<vmem>>, %arg6: memref<1x2x2xf32, #tpu.memory_space<vmem>>) attributes {dimension_semantics = [#tpu.dimension_semantics<parallel>, #tpu.dimension_semantics<arbitrary>], iteration_bounds = array<i64: 1, 1>, scalar_prefetch = 0 : i64, scratch_operands = 0 : i64, tpu.core_type = #tpu.core_type<tc>, window_params = [{transform_indices = @transform_0, window_bounds = array<i64: 2, 1024>}, {transform_indices = @transform_1, window_bounds = array<i64: 2, 1024>}, {transform_indices = @transform_2, window_bounds = array<i64: 1, 2, 2>}, {transform_indices = @transform_3, window_bounds = array<i64: 1, 2, 2>}, {transform_indices = @transform_4, window_bounds = array<i64: 1, 2, 2>}]} {
    %c0_i32 = arith.constant 0 : i32
    %0 = arith.cmpi eq, %arg1, %c0_i32 : i32
    %1 = arith.extui %0 : i1 to i32
    %c0_i32_0 = arith.constant 0 : i32
    %2 = arith.cmpi ne, %1, %c0_i32_0 : i32
    scf.if %2 {
      %cst_24 = arith.constant 0.000000e+00 : f32
      %26 = vector.broadcast %cst_24 : f32 to vector<2x2xf32>
      %c0_25 = arith.constant 0 : index
      %c0_26 = arith.constant 0 : index
      %c0_27 = arith.constant 0 : index
      %27 = vector.load %arg4[%c0_25, %c0_26, %c0_27] : memref<1x2x2xf32, #tpu.memory_space<vmem>>, vector<1x2x2xf32>
      %28 = vector.shape_cast %27 : vector<1x2x2xf32> to vector<2x2xf32>
      %29 = vector.shape_cast %26 : vector<2x2xf32> to vector<1x2x2xf32>
      tpu.vector_store %arg4[%c0_25, %c0_26, %c0_27], %29 {strides = array<i32>} : memref<1x2x2xf32, #tpu.memory_space<vmem>>, vector<1x2x2xf32>,
      %cst_28 = arith.constant 0.000000e+00 : f32
      %30 = vector.broadcast %cst_28 : f32 to vector<2x2xf32>
      %c0_29 = arith.constant 0 : index
      %c0_30 = arith.constant 0 : index
      %c0_31 = arith.constant 0 : index
      %31 = vector.load %arg5[%c0_29, %c0_30, %c0_31] : memref<1x2x2xf32, #tpu.memory_space<vmem>>, vector<1x2x2xf32>
      %32 = vector.shape_cast %31 : vector<1x2x2xf32> to vector<2x2xf32>
      %33 = vector.shape_cast %30 : vector<2x2xf32> to vector<1x2x2xf32>
      tpu.vector_store %arg5[%c0_29, %c0_30, %c0_31], %33 {strides = array<i32>} : memref<1x2x2xf32, #tpu.memory_space<vmem>>, vector<1x2x2xf32>,
      %cst_32 = arith.constant 0.000000e+00 : f32
      %34 = vector.broadcast %cst_32 : f32 to vector<2x2xf32>
      %c0_33 = arith.constant 0 : index
      %c0_34 = arith.constant 0 : index
      %c0_35 = arith.constant 0 : index
      %35 = vector.load %arg6[%c0_33, %c0_34, %c0_35] : memref<1x2x2xf32, #tpu.memory_space<vmem>>, vector<1x2x2xf32>
      %36 = vector.shape_cast %35 : vector<1x2x2xf32> to vector<2x2xf32>
      %37 = vector.shape_cast %34 : vector<2x2xf32> to vector<1x2x2xf32>
      tpu.vector_store %arg6[%c0_33, %c0_34, %c0_35], %37 {strides = array<i32>} : memref<1x2x2xf32, #tpu.memory_space<vmem>>, vector<1x2x2xf32>,
    } else {
    }
    %c0 = arith.constant 0 : index
    %c0_1 = arith.constant 0 : index
    %3 = vector.load %arg2[%c0, %c0_1] : memref<2x1024xf32, #tpu.memory_space<vmem>>, vector<2x1024xf32>
    %c0_2 = arith.constant 0 : index
    %c0_3 = arith.constant 0 : index
    %4 = vector.load %arg3[%c0_2, %c0_3] : memref<2x1024xf32, #tpu.memory_space<vmem>>, vector<2x1024xf32>
    %c0_4 = arith.constant 0 : index
    %c0_5 = arith.constant 0 : index
    %c0_6 = arith.constant 0 : index
    %5 = vector.load %arg4[%c0_4, %c0_5, %c0_6] : memref<1x2x2xf32, #tpu.memory_space<vmem>>, vector<1x2x2xf32>
    %6 = vector.shape_cast %5 : vector<1x2x2xf32> to vector<2x2xf32>
    %cst = arith.constant dense<0.000000e+00> : vector<2x2xf32>
    %7 = tpu.matmul %3, %3, %cst {dimension_numbers = #tpu.dot_dimension_numbers<[1], [1], [0], [0], [0, 0, 1, 0], [], []>} : vector<2x1024xf32>, vector<2x1024xf32>, vector<2x2xf32> -> vector<2x2xf32>
    %8 = arith.addf %6, %7 : vector<2x2xf32>
    %c0_7 = arith.constant 0 : index
    %c0_8 = arith.constant 0 : index
    %c0_9 = arith.constant 0 : index
    %9 = vector.load %arg4[%c0_7, %c0_8, %c0_9] : memref<1x2x2xf32, #tpu.memory_space<vmem>>, vector<1x2x2xf32>
    %10 = vector.shape_cast %9 : vector<1x2x2xf32> to vector<2x2xf32>
    %11 = vector.shape_cast %8 : vector<2x2xf32> to vector<1x2x2xf32>
    tpu.vector_store %arg4[%c0_7, %c0_8, %c0_9], %11 {strides = array<i32>} : memref<1x2x2xf32, #tpu.memory_space<vmem>>, vector<1x2x2xf32>,
    %c0_10 = arith.constant 0 : index
    %c0_11 = arith.constant 0 : index
    %c0_12 = arith.constant 0 : index
    %12 = vector.load %arg5[%c0_10, %c0_11, %c0_12] : memref<1x2x2xf32, #tpu.memory_space<vmem>>, vector<1x2x2xf32>
    %13 = vector.shape_cast %12 : vector<1x2x2xf32> to vector<2x2xf32>
    %cst_13 = arith.constant dense<0.000000e+00> : vector<2x2xf32>
    %14 = tpu.matmul %3, %4, %cst_13 {dimension_numbers = #tpu.dot_dimension_numbers<[1], [1], [0], [0], [0, 0, 1, 0], [], []>} : vector<2x1024xf32>, vector<2x1024xf32>, vector<2x2xf32> -> vector<2x2xf32>
    %15 = arith.addf %13, %14 : vector<2x2xf32>
    %c0_14 = arith.constant 0 : index
    %c0_15 = arith.constant 0 : index
    %c0_16 = arith.constant 0 : index
    %16 = vector.load %arg5[%c0_14, %c0_15, %c0_16] : memref<1x2x2xf32, #tpu.memory_space<vmem>>, vector<1x2x2xf32>
    %17 = vector.shape_cast %16 : vector<1x2x2xf32> to vector<2x2xf32>
    %18 = vector.shape_cast %15 : vector<2x2xf32> to vector<1x2x2xf32>
    tpu.vector_store %arg5[%c0_14, %c0_15, %c0_16], %18 {strides = array<i32>} : memref<1x2x2xf32, #tpu.memory_space<vmem>>, vector<1x2x2xf32>,
    %c0_17 = arith.constant 0 : index
    %c0_18 = arith.constant 0 : index
    %c0_19 = arith.constant 0 : index
    %19 = vector.load %arg6[%c0_17, %c0_18, %c0_19] : memref<1x2x2xf32, #tpu.memory_space<vmem>>, vector<1x2x2xf32>
    %20 = vector.shape_cast %19 : vector<1x2x2xf32> to vector<2x2xf32>
    %cst_20 = arith.constant dense<0.000000e+00> : vector<2x2xf32>
    %21 = tpu.matmul %4, %4, %cst_20 {dimension_numbers = #tpu.dot_dimension_numbers<[1], [1], [0], [0], [0, 0, 1, 0], [], []>} : vector<2x1024xf32>, vector<2x1024xf32>, vector<2x2xf32> -> vector<2x2xf32>
    %22 = arith.addf %20, %21 : vector<2x2xf32>
    %c0_21 = arith.constant 0 : index
    %c0_22 = arith.constant 0 : index
    %c0_23 = arith.constant 0 : index
    %23 = vector.load %arg6[%c0_21, %c0_22, %c0_23] : memref<1x2x2xf32, #tpu.memory_space<vmem>>, vector<1x2x2xf32>
    %24 = vector.shape_cast %23 : vector<1x2x2xf32> to vector<2x2xf32>
    %25 = vector.shape_cast %22 : vector<2x2xf32> to vector<1x2x2xf32>
    tpu.vector_store %arg6[%c0_21, %c0_22, %c0_23], %25 {strides = array<i32>} : memref<1x2x2xf32, #tpu.memory_space<vmem>>, vector<1x2x2xf32>,
    return
  }
  func.func @transform_0(%arg0: i32, %arg1: i32) -> (i32, i32) {
    %c1_i32 = arith.constant 1 : i32
    %0 = arith.muli %arg0, %c1_i32 : i32
    %1 = arith.addi %0, %arg1 : i32
    %c0_i32 = arith.constant 0 : i32
    %c0_i32_0 = arith.constant 0 : i32
    return %c0_i32, %1 : i32, i32
  }
  func.func @transform_1(%arg0: i32, %arg1: i32) -> (i32, i32) {
    %c1_i32 = arith.constant 1 : i32
    %0 = arith.muli %arg0, %c1_i32 : i32
    %1 = arith.addi %0, %arg1 : i32
    %c0_i32 = arith.constant 0 : i32
    %c0_i32_0 = arith.constant 0 : i32
    return %c0_i32, %1 : i32, i32
  }
  func.func @transform_2(%arg0: i32, %arg1: i32) -> (i32, i32, i32) {
    %c0_i32 = arith.constant 0 : i32
    %c0_i32_0 = arith.constant 0 : i32
    %c0_i32_1 = arith.constant 0 : i32
    return %arg0, %c0_i32, %c0_i32_0 : i32, i32, i32
  }
  func.func @transform_3(%arg0: i32, %arg1: i32) -> (i32, i32, i32) {
    %c0_i32 = arith.constant 0 : i32
    %c0_i32_0 = arith.constant 0 : i32
    %c0_i32_1 = arith.constant 0 : i32
    return %arg0, %c0_i32, %c0_i32_0 : i32, i32, i32
  }
  func.func @transform_4(%arg0: i32, %arg1: i32) -> (i32, i32, i32) {
    %c0_i32 = arith.constant 0 : i32
    %c0_i32_0 = arith.constant 0 : i32
    %c0_i32_1 = arith.constant 0 : i32
    return %arg0, %c0_i32, %c0_i32_0 : i32, i32, i32
  }
}

</mosaic_0001>

<bundles_post_ra>
// kernel: tpu_custom_call.1
= control target key start
LH: loop header
LB: loop body
LE: loop exit
PB: predicated region body
PF: predicated region fallthrough
CT: control target
= control target key end

     0   :  { %10 = vsyncpa [#allocation3], 0  ;;  %s1272_s0 = inlined_call_operand.hbm [shape: f32[2,1024], index: 0, kind: input, shape index: {}]   ;;  %s1273_s1 = inlined_call_operand.hbm [shape: f32[2,1024], index: 1, kind: input, shape index: {}]   ;;  %s1274_s2 = inlined_call_operand.hbm [shape: f32[1,2,2], index: 2, kind: output, shape index: {0}]   ;;  %s1275_s3 = inlined_call_operand.hbm [shape: f32[1,2,2], index: 3, kind: output, shape index: {1}]   ;;  %s1276_s4 = inlined_call_operand.hbm [shape: f32[1,2,2], index: 4, kind: output, shape index: {2}]  }
   0x1   :  { %11 = vsyncpa [#allocation6], 0 }
   0x2   :  { %12 = vsyncpa [#allocation4], 0 }
   0x3   :  { %13 = vsyncpa [#allocation9], 0  ;;  %s1174_s15 = smov [#allocation2]   ;;  %s1175_s17 = smov [#allocation5]  }
   0x4   :  { %s24_s16 = sshll.u32 %s1174_s15, 4  ;;  %s38_s18 = sshll.u32 %s1175_s17, 4  ;;  %s25_s16 = int_to_ptr.vmem [resolvable:$true] %s24_s16  ;;  %s39_s18 = int_to_ptr.vmem [resolvable:$true] %s38_s18 }
   0x5   :  { %s1056_s21 = scalar_lea.hbm %s1272_s0, 256 }
   0x6   :  { %p1057_p0 = scmp.ne.s32.totalorder %s1272_s0, %s1056_s21  ;;  %p1060_p1 = scmp.lt.u32.totalorder %s1056_s21, %s1272_s0 }
   0x8   :  { %p1062_p2 = pnand %p1060_p1, %p1057_p0 }
   0xa   :  { %1065 = shalt.err (!%p1062_p2)
}
   0xb   :  { %s1066_s26 = scalar_lea.vmem %s25_s16, 256  ;;  %p1071_p4 = scmp.lt.s32.totalorder %s25_s16, %s25_s16 }
   0xc   :  { %p1067_p3 = scmp.ne.s32.totalorder %s25_s16, %s1066_s26  ;;  %p1072_p5 = scmp.lt.s32.totalorder %s1066_s26, %s1066_s26 }
   0xe   :  { %p1073_p6 = por %p1072_p5, %p1071_p4 }
  0x10   :  { %p1074_p7 = pnand %p1073_p6, %p1067_p3 }
  0x12   :  { %1077 = shalt.err (!%p1074_p7)
}
  0x13   :  { %27 = dma.hbm_to_vmem [thread:$0]  %s1272_s0, 256, %s25_s16, [#allocation3]  }
  0x14   :  { %s1078_s5 = scalar_lea.hbm %s1273_s1, 256 }
  0x15   :  { %p1079_p8 = scmp.ne.s32.totalorder %s1273_s1, %s1078_s5  ;;  %p1082_p9 = scmp.lt.u32.totalorder %s1078_s5, %s1273_s1 }
  0x17   :  { %p1084_p10 = pnand %p1082_p9, %p1079_p8 }
  0x19   :  { %1087 = shalt.err (!%p1084_p10)
}
  0x1a   :  { %s1088_s10 = scalar_lea.vmem %s39_s18, 256  ;;  %p1093_p12 = scmp.lt.s32.totalorder %s39_s18, %s39_s18 }
  0x1b   :  { %p1089_p11 = scmp.ne.s32.totalorder %s39_s18, %s1088_s10  ;;  %p1094_p13 = scmp.lt.s32.totalorder %s1088_s10, %s1088_s10 }
  0x1d   :  { %p1095_p0 = por %p1094_p13, %p1093_p12 }
  0x1f   :  { %p1096_p1 = pnand %p1095_p0, %p1089_p11 }
  0x21   :  { %1099 = shalt.err (!%p1096_p1)
}
  0x22   :  { %41 = dma.hbm_to_vmem [thread:$0]  %s1273_s1, 256, %s39_s18, [#allocation6]  }
  0x23   :  { %1166 = dma.done.wait [#allocation3], 256  }
  0x24   :  { %1167 = vsyncadd [#allocation3], 4294967040 }
  0x25   :  { %1168 = dma.done.wait [#allocation6], 256  }
  0x26   :  { %1169 = vsyncadd [#allocation6], 4294967040  ;;  %v71_v0 = vlaneseq  ;;  %v1176_v1 = vmov 1983009808   ;;  %v60_v6 = vld [vmem:[#allocation2] sm:$0xff]  ;;  %v61_v7 = vld [vmem:[#allocation2 + $0x8] sm:$0xff] }
  0x27   :  { %v69_v2 = vunpack.c.l.s4 %v1176_v1  ;;  %v62_v8 = vld [vmem:[#allocation5] sm:$0xff]  ;;  %v67_v10 = vcombine.high %v60_v6, %v60_v6  ;;  %v84_v12 = vcombine.high %v61_v7, %v61_v7  ;;  %v63_v13 = vld [vmem:[#allocation5 + $0x8] sm:$0xff]  ;;  %vm56_vm0 = vcmask 9216   ;;  %s1178_s1 = smov [#allocation7]  }
  0x28   :  { %v72_v3 = vshrl.u32 %v71_v0, 7  ;;  %v395_v15 = vcombine.high %v62_v8, %v62_v8  ;;  %v412_v20 = vcombine.high %v63_v13, %v63_v13  ;;  %v1177_v30 = vmov 0.0   ;;  %s1008_s12 = sshll.u32 %s1178_s1, 4  ;;  %s1009_s12 = int_to_ptr.vmem [resolvable:$true] %s1008_s12 }
  0x29   :  { %v70_v4 = vunpack.c.0.s8 %v69_v2  ;;  %57 = vst.msk [vmem:[#allocation7] sm:$0x3] %vm56_vm0, %v1177_v30  ;;  %58 = vst.msk [vmem:[#allocation8] sm:$0x3] %vm56_vm0, %v1177_v30  ;;  %s1100_s13 = scalar_lea.vmem %s1009_s12, 32  ;;  %p1105_p3 = scmp.lt.s32.totalorder %s1009_s12, %s1009_s12 }
  0x2a   :  { %59 = vst.msk [vmem:[#allocation10] sm:$0x3] %vm56_vm0, %v1177_v30  ;;  %p1101_p2 = scmp.ne.s32.totalorder %s1009_s12, %s1100_s13  ;;  %p1106_p4 = scmp.lt.s32.totalorder %s1100_s13, %s1100_s13 }
  0x2b   :  { %v73_v5 = vsub.s32 %v70_v4, %v72_v3 }
  0x2c   :  { %p1107_p5 = por %p1106_p4, %p1105_p3 }
  0x2d   :  { %v74_v9 = vrot.slane %v60_v6, %v73_v5  ;;  %v91_v11 = vrot.slane %v61_v7, %v73_v5  ;;  %v402_v14 = vrot.slane %v62_v8, %v73_v5  ;;  %v81_v17 = vrot.slane %v67_v10, %v73_v5 }
  0x2e   :  { %v98_v19 = vrot.slane %v84_v12, %v73_v5  ;;  %v409_v23 = vrot.slane %v395_v15, %v73_v5  ;;  %v419_v25 = vrot.slane %v63_v13, %v73_v5  ;;  %v426_v27 = vrot.slane %v412_v20, %v73_v5  ;;  %p1108_p6 = pnand %p1107_p5, %p1101_p2 }
  0x2f   :  { %v82_v16 = vcombine.high %v74_v9, %v74_v9  ;;  %v99_v18 = vcombine.high %v91_v11, %v91_v11  ;;  %v83_v21 = vcombine.high %v81_v17, %v81_v17  ;;  %v410_v24 = vcombine.high %v402_v14, %v402_v14 }
  0x30   :  { %v100_v22 = vcombine.high %v98_v19, %v98_v19  ;;  %v411_v26 = vcombine.high %v409_v23, %v409_v23  ;;  %v427_v28 = vcombine.high %v419_v25, %v419_v25  ;;  %v428_v29 = vcombine.high %v426_v27, %v426_v27  ;;  %v64_v39 = vld [vmem:[#allocation7] sm:$0x3] }
  0x31   :  { %109 = vmatprep.subr.mxu0 %v82_v16  ;;  %173 = vmatprep.mubr.f32.mxu0 %v82_v16 }
  0x32   :  { %110 = vmatpush1.xpose.msra.mxu0 %v74_v9  ;;  %179 = vmatprep.subr.mxu1 %v83_v21 }
  0x33   :  { %249 = vmatprep.subr.mxu0 %v99_v18  ;;  %180 = vmatpush1.xpose.msra.mxu1 %v81_v17 }
  0x34   :  { %243 = vmatprep.mubr.f32.mxu1 %v83_v21  ;;  %319 = vmatprep.subr.mxu1 %v100_v22 }
  0x35   :  { %174 = vmatmul.mubr.f32.vlgmr.msra.gmra.mrb[0].mxu0 %v74_v9 }
  0x36   :  { %250 = vmatpush1.xpose.msra.mxu0 %v91_v11  ;;  %313 = vmatprep.mubr.f32.mxu0 %v99_v18 }
  0x37   :  { %244 = vmatmul.mubr.f32.vlgmr.msra.gmra.mrb[0].mxu1 %v81_v17  ;;  %437 = vmatprep.subr.mxu0 %v410_v24 }
  0x38   :  { %320 = vmatpush1.xpose.msra.mxu1 %v98_v19  ;;  %383 = vmatprep.mubr.f32.mxu1 %v100_v22 }
  0x39   :  { %314 = vmatmul.mubr.f32.vlgmr.msra.gmra.mrb[2].mxu0 %v91_v11  ;;  %507 = vmatprep.subr.mxu1 %v411_v26 }
  0x3a   :  { %438 = vmatpush1.xpose.msra.mxu0 %v402_v14  ;;  %501 = vmatprep.mubr.f32.mxu0 %v82_v16 }
  0x3b   :  { %384 = vmatmul.mubr.f32.vlgmr.msra.gmra.mrb[2].mxu1 %v98_v19  ;;  %577 = vmatprep.subr.mxu0 %v427_v28 }
  0x3c   :  { %508 = vmatpush1.xpose.msra.mxu1 %v409_v23  ;;  %571 = vmatprep.mubr.f32.mxu1 %v83_v21 }
  0x3d   :  { %502 = vmatmul.mubr.f32.vlgmr.msra.gmra.mrb[4].mxu0 %v74_v9  ;;  %647 = vmatprep.subr.mxu1 %v428_v29 }
  0x3e   :  { %578 = vmatpush1.xpose.msra.mxu0 %v419_v25  ;;  %641 = vmatprep.mubr.f32.mxu0 %v99_v18 }
  0x3f   :  { %572 = vmatmul.mubr.f32.vlgmr.msra.gmra.mrb[4].mxu1 %v81_v17  ;;  %720 = vmatprep.subr.mxu0 %v410_v24 }
  0x40   :  { %648 = vmatpush1.xpose.msra.mxu1 %v426_v27  ;;  %711 = vmatprep.mubr.f32.mxu1 %v100_v22 }
  0x41   :  { %642 = vmatmul.mubr.f32.vlgmr.msra.gmra.mrb[6].mxu0 %v91_v11  ;;  %790 = vmatprep.subr.mxu1 %v411_v26 }
  0x42   :  { %721 = vmatpush1.xpose.msra.mxu0 %v402_v14  ;;  %784 = vmatprep.mubr.f32.mxu0 %v410_v24 }
  0x43   :  { %712 = vmatmul.mubr.f32.vlgmr.msra.gmra.mrb[6].mxu1 %v98_v19  ;;  %860 = vmatprep.subr.mxu0 %v427_v28 }
  0x44   :  { %791 = vmatpush1.xpose.msra.mxu1 %v409_v23  ;;  %854 = vmatprep.mubr.f32.mxu1 %v411_v26 }
  0x45   :  { %785 = vmatmul.mubr.f32.vlgmr.msra.gmra.mrb[8].mxu0 %v402_v14  ;;  %930 = vmatprep.subr.mxu1 %v428_v29 }
  0x46   :  { %861 = vmatpush1.xpose.msra.mxu0 %v419_v25  ;;  %924 = vmatprep.mubr.f32.mxu0 %v427_v28 }
  0x47   :  { %855 = vmatmul.mubr.f32.vlgmr.msra.gmra.mrb[8].mxu1 %v409_v23 }
  0x48   :  { %931 = vmatpush1.xpose.msra.mxu1 %v426_v27  ;;  %994 = vmatprep.mubr.f32.mxu1 %v428_v29 }
  0x49   :  { %925 = vmatmul.mubr.f32.vlgmr.msra.gmra.mrb[10].mxu0 %v419_v25 }
  0x4b   :  { %995 = vmatmul.mubr.f32.vlgmr.msra.gmra.mrb[10].mxu1 %v426_v27 }
 0x108   :  { %v175_v31 = vpop.f32.mrb[0].mxu0 }
 0x109   :  { %v177_v32 = vpop.f32.mrb[1].mxu0 }
 0x10a   :  { %v245_v33 = vpop.f32.mrb[0].mxu1 }
 0x10b   :  { %v246_v34 = vadd.f32 %v245_v33, %v175_v31  ;;  %v247_v35 = vpop.f32.mrb[1].mxu1 }
 0x10c   :  { %v315_v36 = vpop.f32.mrb[2].mxu0 }
 0x10d   :  { %v316_v37 = vadd.f32 %v315_v36, %v246_v34  ;;  %v317_v38 = vpop.f32.mrb[3].mxu0 }
 0x10e   :  { %v385_v40 = vpop.f32.mrb[2].mxu1 }
 0x10f   :  { %v386_v41 = vadd.f32 %v385_v40, %v316_v37  ;;  %v387_v42 = vpop.f32.mrb[3].mxu1 }
 0x110   :  { %v503_v43 = vpop.f32.mrb[4].mxu0 }
 0x111   :  { %v389_v44 = vadd.f32 %v386_v41, %v64_v39  ;;  %v505_v45 = vpop.f32.mrb[5].mxu0 }
 0x112   :  { %v573_v46 = vpop.f32.mrb[4].mxu1 }
 0x113   :  { %391 = vst.msk [vmem:[#allocation7] sm:$0x3] %vm56_vm0, %v389_v44  ;;  %v574_v47 = vadd.f32 %v573_v46, %v503_v43  ;;  %v575_v48 = vpop.f32.mrb[5].mxu1 }
 0x114   :  { %v643_v49 = vpop.f32.mrb[6].mxu0 }
 0x115   :  { %1111 = shalt.err (!%p1108_p6)
}
 0x116   :  { %s1112_s16 = scalar_lea.hbm %s1274_s2, 32 }
 0x117   :  { %p1113_p7 = scmp.ne.s32.totalorder %s1274_s2, %s1112_s16  ;;  %p1116_p8 = scmp.lt.u32.totalorder %s1112_s16, %s1274_s2 }
 0x119   :  { %p1118_p9 = pnand %p1116_p8, %p1113_p7 }
 0x11b   :  { %1121 = shalt.err (!%p1118_p9)
}
 0x11c   :  { %1011 = dma.vmem_to_hbm [thread:$0]  %s1009_s12, 32, %s1274_s2, [#allocation4]   ;;  %v644_v50 = vadd.f32 %v643_v49, %v574_v47  ;;  %v645_v51 = vpop.f32.mrb[7].mxu0  ;;  %v392_v52 = vld [vmem:[#allocation8] sm:$0x3]  ;;  %v713_v53 = vpop.f32.mrb[6].mxu1 }
 0x11d   :  { %s1179_s23 = smov [#allocation8]   ;;  %v715_v55 = vpop.f32.mrb[7].mxu1  ;;  %v786_v56 = vpop.f32.mrb[8].mxu0 }
 0x11e   :  { %s1018_s24 = sshll.u32 %s1179_s23, 4  ;;  %v714_v54 = vadd.f32 %v713_v53, %v644_v50  ;;  %v788_v58 = vpop.f32.mrb[9].mxu0  ;;  %v856_v59 = vpop.f32.mrb[8].mxu1  ;;  %s1019_s24 = int_to_ptr.vmem [resolvable:$true] %s1018_s24 }
 0x11f   :  { %v857_v60 = vadd.f32 %v856_v59, %v786_v56  ;;  %v858_v61 = vpop.f32.mrb[9].mxu1  ;;  %v926_v62 = vpop.f32.mrb[10].mxu0  ;;  %s1122_s25 = scalar_lea.vmem %s1019_s24, 32  ;;  %p1127_p11 = scmp.lt.s32.totalorder %s1019_s24, %s1019_s24 }
 0x120   :  { %v717_v57 = vadd.f32 %v714_v54, %v392_v52  ;;  %p1123_p10 = scmp.ne.s32.totalorder %s1019_s24, %s1122_s25  ;;  %p1128_p12 = scmp.lt.s32.totalorder %s1122_s25, %s1122_s25 }
 0x122   :  { %718 = vst.msk [vmem:[#allocation8] sm:$0x3] %vm56_vm0, %v717_v57  ;;  %p1129_p13 = por %p1128_p12, %p1127_p11 }
 0x124   :  { %p1130_p0 = pnand %p1129_p13, %p1123_p10 }
 0x126   :  { %1133 = shalt.err (!%p1130_p0)
}
 0x127   :  { %s1134_s27 = scalar_lea.hbm %s1275_s3, 32 }
 0x128   :  { %p1135_p1 = scmp.ne.s32.totalorder %s1275_s3, %s1134_s27  ;;  %p1138_p2 = scmp.lt.u32.totalorder %s1134_s27, %s1275_s3 }
 0x12a   :  { %p1140_p3 = pnand %p1138_p2, %p1135_p1 }
 0x12c   :  { %1143 = shalt.err (!%p1140_p3)
}
 0x12d   :  { %1021 = dma.vmem_to_hbm [thread:$0]  %s1019_s24, 32, %s1275_s3, [#allocation9]   ;;  %v927_v63 = vadd.f32 %v926_v62, %v857_v60  ;;  %v928_v0 = vpop.f32.mrb[11].mxu0  ;;  %v719_v1 = vld [vmem:[#allocation10] sm:$0x3]  ;;  %v996_v2 = vpop.f32.mrb[10].mxu1 }
 0x12e   :  { %s1180_s8 = smov [#allocation10]   ;;  %v998_v4 = vpop.f32.mrb[11].mxu1 }
 0x12f   :  { %s1028_s9 = sshll.u32 %s1180_s8, 4  ;;  %v997_v3 = vadd.f32 %v996_v2, %v927_v63  ;;  %s1029_s9 = int_to_ptr.vmem [resolvable:$true] %s1028_s9 }
 0x130   :  { %s1144_s10 = scalar_lea.vmem %s1029_s9, 32  ;;  %p1149_p5 = scmp.lt.s32.totalorder %s1029_s9, %s1029_s9 }
 0x131   :  { %v1000_v5 = vadd.f32 %v997_v3, %v719_v1  ;;  %p1145_p4 = scmp.ne.s32.totalorder %s1029_s9, %s1144_s10  ;;  %p1150_p6 = scmp.lt.s32.totalorder %s1144_s10, %s1144_s10 }
 0x133   :  { %1001 = vst.msk [vmem:[#allocation10] sm:$0x3] %vm56_vm0, %v1000_v5  ;;  %p1151_p7 = por %p1150_p6, %p1149_p5 }
 0x135   :  { %p1152_p8 = pnand %p1151_p7, %p1145_p4 }
 0x137   :  { %1155 = shalt.err (!%p1152_p8)
}
 0x138   :  { %s1156_s11 = scalar_lea.hbm %s1276_s4, 32 }
 0x139   :  { %p1157_p9 = scmp.ne.s32.totalorder %s1276_s4, %s1156_s11  ;;  %p1160_p10 = scmp.lt.u32.totalorder %s1156_s11, %s1276_s4 }
 0x13b   :  { %p1162_p11 = pnand %p1160_p10, %p1157_p9 }
 0x13d   :  { %1165 = shalt.err (!%p1162_p11)
}
 0x13e   :  { %1031 = dma.vmem_to_hbm [thread:$0]  %s1029_s9, 32, %s1276_s4, [#allocation9]  }
 0x13f   :  { %1170 = dma.done.wait [#allocation4], 32  }
 0x140   :  { %1171 = vsyncadd [#allocation4], 4294967264 }
 0x141   :  { %1172 = dma.done.wait [#allocation9], 64  }
 0x142   :  { %1173 = vsyncadd [#allocation9], 4294967232 }
 0x143   :  { %1041 = vsyncpa [#allocation3], 1 }
 0x144   :  { %1042 = vsyncpa [#allocation6], 1 }
 0x145   :  { %1043 = vsyncpa [#allocation4], 1 }
 0x146   :  { %1044 = vsyncpa [#allocation9], 1 }

</bundles_post_ra>
